<compile_context>
chip_gen: v7x
topology: tpu7x:2x2x1
jax: 0.10.0
libtpu: 0.0.40
codegen_flags: <defaults>
</compile_context>

<pallas_src>
import functools

import jax
import jax.numpy as jnp
from jax.experimental import pallas as pl
from jax.experimental.pallas import tpu as pltpu


# ----------------------------- helpers ---------------------------------------

def _round_up(x, m):
    return (x + m - 1) // m * m


def _apply_activation(y, activation):
    if activation == "swish":
        return y * jax.nn.sigmoid(y)
    elif activation == "leaky_relu":
        return jnp.where(y >= 0, y, 0.01 * y)
    elif activation == "linear":
        return y
    else:
        raise ValueError(f"unknown activation {activation!r}")


# ----------------------------- kernel body ------------------------------------

def _actor_ensemble_kernel(*refs, n_total_layers, activation, e_block,
                           shared_states, compute_dtype):
    """refs = (x_ref, w0, b0, w1, b1, ..., wN, bN, o_ref).

    Blocks carry E_BLOCK ensemble members (leading dim) and one batch tile.
    Weights are bf16; matmuls accumulate in f32 on the MXU; activation math
    stays in f32 (v5e VPU/EUP have no bf16).
    """
    x_ref = refs[0]
    o_ref = refs[-1]
    wb_refs = refs[1:-1]
    assert len(wb_refs) == 2 * n_total_layers

    if shared_states:
        # Same batch tile feeds every ensemble member (forward_all path);
        # cast once per grid step, not once per member.
        h_shared = x_ref[...].astype(compute_dtype)            # (TB, d_state)

    for ei in range(e_block):                                  # static unroll
        if shared_states:
            h = h_shared
        else:
            h = x_ref[ei].astype(compute_dtype)                # (TB, d_state)
        for lyr in range(n_total_layers):
            w = wb_refs[2 * lyr][ei]                           # (d_in, d_out) bf16
            b = wb_refs[2 * lyr + 1][ei]                       # (1, d_out)   f32
            y = jnp.dot(h, w, preferred_element_type=jnp.float32) + b
            act = activation if lyr < n_total_layers - 1 else "linear"
            y = _apply_activation(y, act)                      # f32
            h = y if lyr == n_total_layers - 1 else y.astype(compute_dtype)
        o_ref[ei] = h.astype(o_ref.dtype)                      # lane-dense store


# ----------------------------- wrapper ----------------------------------------

class ActorEnsemblePallas:
    """JAX/Pallas re-implementation of ActorEnsemble.forward / forward_all."""

    def __init__(self, d_action, d_state, n_units, n_layers, ensemble_size,
                 activation="swish", seed=0, param_dtype=jnp.bfloat16):
        assert n_layers >= 2, "minimum depth of model is 2"
        self.d_action = d_action
        self.d_state = d_state
        self.n_units = n_units
        self.n_layers = n_layers
        self.ensemble_size = ensemble_size
        self.activation = activation
        self.param_dtype = param_dtype
        # Output padded to a multiple of 128 lanes (unmasked vst); sliced back
        # to d_action in the wrapper.
        self.d_action_pad = _round_up(d_action, 128)

        # Deterministic parameter init (mirrors EnsembleLayer shapes:
        # W [E, d_in, d_out], b [E, 1, d_out]).  Last-layer params are padded
        # with zeros to d_action_pad (zeros propagate -> padded lanes are 0).
        key = jax.random.PRNGKey(seed)
        self.weights = []
        self.biases = []
        dims = [d_state] + [n_units] * n_layers + [d_action]
        for lyr in range(n_layers + 1):
            d_in, d_out = dims[lyr], dims[lyr + 1]
            key, wk, bk = jax.random.split(key, 3)
            scale = 1.0 / (d_in ** 0.5)
            w = scale * jax.random.truncated_normal(
                wk, -2.0, 2.0, (ensemble_size, d_in, d_out), jnp.float32)
            b = 0.01 * jax.random.normal(
                bk, (ensemble_size, 1, d_out), jnp.float32)
            if lyr == n_layers and self.d_action_pad != d_out:
                pad = self.d_action_pad - d_out
                w = jnp.pad(w, ((0, 0), (0, 0), (0, pad)))
                b = jnp.pad(b, ((0, 0), (0, 0), (0, pad)))
            self.weights.append(w.astype(param_dtype))   # bf16 weights
            self.biases.append(b)                        # f32 biases

    # ------------------------------------------------------------------ core

    def _run(self, states, shared):
        E = self.ensemble_size
        if shared:
            B, d_state = states.shape
        else:
            e, B, d_state = states.shape
            assert e == E
        assert d_state == self.d_state
        n_total = self.n_layers + 1

        # ---- batch tiling: biggest tile that keeps VMEM/vreg pressure sane;
        #      sublane-aligned (multiple of 8).
        TB = min(512, _round_up(B, 8))
        nbt = pl.cdiv(B, TB)
        B_pad = nbt * TB
        if B_pad != B:
            if shared:
                states_p = jnp.pad(states, ((0, B_pad - B), (0, 0)))
            else:
                states_p = jnp.pad(states, ((0, 0), (0, B_pad - B), (0, 0)))
        else:
            states_p = states

        # ---- ensemble blocking: fatter steps for tiny MLPs (<= ~4 MiB of
        #      bf16 weights per grid step), 1 member/step for large ones.
        w_itemsize = jnp.dtype(self.param_dtype).itemsize
        per_member_w_bytes = sum(
            int(w.shape[1]) * int(w.shape[2]) for w in self.weights) * w_itemsize
        e_block = max(1, min(E, (4 << 20) // max(per_member_w_bytes, 1)))
        while E % e_block:
            e_block -= 1
        n_eb = E // e_block

        # ---- grid ordering: the operand whose index_map ignores the inner
        #      grid axis stays VMEM-resident.  Pick the order that minimizes
        #      total HBM traffic.  (Per-member states make weight residency
        #      always optimal; for shared states it depends on sizes.)
        act_itemsize = states.dtype.itemsize
        w_total_bytes = E * per_member_w_bytes
        if shared:
            s_total_bytes = B_pad * self.d_state * act_itemsize
            traffic_batch_inner = w_total_bytes + n_eb * s_total_bytes
            traffic_ens_inner = nbt * w_total_bytes + s_total_bytes
            batch_inner = traffic_batch_inner <= traffic_ens_inner
        else:
            batch_inner = True

        if batch_inner:
            grid = (n_eb, nbt)

            def _states_map_shared(ei, bi):
                return (bi, 0)

            def _states_map_full(ei, bi):
                return (ei, bi, 0)

            def _w_map(ei, bi):
                return (ei, 0, 0)

            def _out_map(ei, bi):
                return (ei, bi, 0)
        else:
            grid = (nbt, n_eb)

            def _states_map_shared(bi, ei):
                return (bi, 0)

            def _states_map_full(bi, ei):
                return (ei, bi, 0)

            def _w_map(bi, ei):
                return (ei, 0, 0)

            def _out_map(bi, ei):
                return (ei, bi, 0)

        kernel = functools.partial(
            _actor_ensemble_kernel,
            n_total_layers=n_total,
            activation=self.activation,
            e_block=e_block,
            shared_states=shared,
            compute_dtype=self.param_dtype,
        )

        # ---- BlockSpecs.
        in_specs = []
        if shared:
            in_specs.append(
                pl.BlockSpec((TB, self.d_state), _states_map_shared))
        else:
            in_specs.append(
                pl.BlockSpec((e_block, TB, self.d_state), _states_map_full))
        operands = [states_p]
        for w, bias in zip(self.weights, self.biases):
            _, d_in, d_out = w.shape
            in_specs.append(pl.BlockSpec((e_block, d_in, d_out), _w_map))
            in_specs.append(pl.BlockSpec((e_block, 1, d_out), _w_map))
            operands.append(w)
            operands.append(bias)

        out_spec = pl.BlockSpec((e_block, TB, self.d_action_pad), _out_map)

        # ---- explicit VMEM budget (double-buffered blocks + margin), capped
        #      at v7x's 64 MiB physical VMEM per TensorCore.
        bytes_states = (TB * self.d_state if shared
                        else e_block * TB * self.d_state) * act_itemsize
        bytes_w = e_block * per_member_w_bytes
        bytes_b = e_block * sum(
            8 * max(128, int(bb.shape[2])) for bb in self.biases) * 4
        bytes_out = e_block * TB * self.d_action_pad * act_itemsize
        need = 2 * (bytes_states + bytes_w + bytes_b + bytes_out) + (8 << 20)
        vmem_limit = int(min(max(need, 32 << 20), 64 << 20))
        # TODO(synk): for very large n_units the per-member weight set may not
        # fit v7x's 64 MiB VMEM; tiling d_out of the hidden weights would be
        # the next step.

        out = pl.pallas_call(
            kernel,
            out_shape=jax.ShapeDtypeStruct((E, B_pad, self.d_action_pad),
                                           states.dtype),
            grid_spec=pltpu.PrefetchScalarGridSpec(
                num_scalar_prefetch=0,
                grid=grid,
                in_specs=in_specs,
                out_specs=out_spec,
            ),
            compiler_params=pltpu.CompilerParams(
                dimension_semantics=("parallel", "parallel"),
                vmem_limit_bytes=vmem_limit),
        )(*operands)

        return out[:, :B, :self.d_action]

    # ------------------------------------------------------------------ API

    def forward(self, states):
        """states: [ensemble_size, batch, d_state] -> [E, batch, d_action]"""
        return self._run(states, shared=False)

    def forward_all(self, states):
        """states: [batch, d_state] -> [ensemble_size, batch, d_action].

        No E-fold broadcast is materialized; either the shared state tile or
        the weight blocks stay VMEM resident (whichever is cheaper).
        """
        return self._run(states, shared=True)


# ----------------------------- pure-JAX reference ------------------------------

def _reference_forward(model, states):
    """states: [E, B, d_state]; mirrors the kernel's bf16/f32 casting."""
    h = states.astype(jnp.float32)
    n_total = model.n_layers + 1
    for lyr in range(n_total):
        w = model.weights[lyr]                        # bf16 (padded last layer)
        b = model.biases[lyr]                         # f32
        y = jnp.einsum("ebi,eio->ebo", h.astype(w.dtype), w,
                       preferred_element_type=jnp.float32) + b
        act = model.activation if lyr < n_total - 1 else "linear"
        h = _apply_activation(y, act)
    return h[:, :, :model.d_action].astype(states.dtype)


# ----------------------------- main --------------------------------------------

if __name__ == "__main__":
    # Small, forward-consistent shapes.
    d_state, d_action = 8, 4
    n_units, n_layers = 32, 2
    ensemble_size, batch = 4, 8

    model = ActorEnsemblePallas(
        d_action=d_action, d_state=d_state, n_units=n_units,
        n_layers=n_layers, ensemble_size=ensemble_size,
        activation="swish", seed=0)

    key = jax.random.PRNGKey(0)
    states_2d = jax.random.normal(key, (batch, d_state), jnp.float32)

    # forward_all: shared states, no broadcast materialized.
    out_all = jax.block_until_ready(model.forward_all(states_2d))
    assert out_all.shape == (ensemble_size, batch, d_action)
    ref_all = _reference_forward(
        model, jnp.broadcast_to(states_2d[None],
                                (ensemble_size, batch, d_state)))
    assert jnp.allclose(out_all, ref_all, atol=1e-2, rtol=1e-2), \
        "forward_all mismatch vs reference"

    # forward: per-ensemble states.
    key2 = jax.random.PRNGKey(1)
    states_3d = jax.random.normal(
        key2, (ensemble_size, batch, d_state), jnp.float32)
    out_fw = jax.block_until_ready(model.forward(states_3d))
    assert out_fw.shape == (ensemble_size, batch, d_action)
    ref_fw = _reference_forward(model, states_3d)
    assert jnp.allclose(out_fw, ref_fw, atol=1e-2, rtol=1e-2), \
        "forward mismatch vs reference"

    print("KERNEL_OK")
</pallas_src>

<mosaic_0001>
module attributes {stable_mosaic.version = 11 : i64} {
  func.func @_actor_ensemble_kernel(%arg0: i32, %arg1: i32, %arg2: memref<8x8xf32, #tpu.memory_space<vmem>>, %arg3: memref<4x8x32xbf16, #tpu.memory_space<vmem>>, %arg4: memref<4x1x32xf32, #tpu.memory_space<vmem>>, %arg5: memref<4x32x32xbf16, #tpu.memory_space<vmem>>, %arg6: memref<4x1x32xf32, #tpu.memory_space<vmem>>, %arg7: memref<4x32x128xbf16, #tpu.memory_space<vmem>>, %arg8: memref<4x1x128xf32, #tpu.memory_space<vmem>>, %arg9: memref<4x8x128xf32, #tpu.memory_space<vmem>>) attributes {dimension_semantics = [#tpu.dimension_semantics<parallel>, #tpu.dimension_semantics<parallel>], iteration_bounds = array<i64: 1, 1>, scalar_prefetch = 0 : i64, scratch_operands = 0 : i64, tpu.core_type = #tpu.core_type<tc>, window_params = [{transform_indices = @transform_0, window_bounds = array<i64: 8, 8>}, {transform_indices = @transform_1, window_bounds = array<i64: 4, 8, 32>}, {transform_indices = @transform_2, window_bounds = array<i64: 4, 1, 32>}, {transform_indices = @transform_3, window_bounds = array<i64: 4, 32, 32>}, {transform_indices = @transform_4, window_bounds = array<i64: 4, 1, 32>}, {transform_indices = @transform_5, window_bounds = array<i64: 4, 32, 128>}, {transform_indices = @transform_6, window_bounds = array<i64: 4, 1, 128>}, {transform_indices = @transform_7, window_bounds = array<i64: 4, 8, 128>}]} {
    %c0 = arith.constant 0 : index
    %c0_0 = arith.constant 0 : index
    %0 = vector.load %arg2[%c0, %c0_0] : memref<8x8xf32, #tpu.memory_space<vmem>>, vector<8x8xf32>
    %1 = arith.truncf %0 : vector<8x8xf32> to vector<8x8xbf16>
    %c0_1 = arith.constant 0 : index
    %c0_2 = arith.constant 0 : index
    %c0_3 = arith.constant 0 : index
    %2 = vector.load %arg3[%c0_1, %c0_2, %c0_3] : memref<4x8x32xbf16, #tpu.memory_space<vmem>>, vector<1x8x32xbf16>
    %3 = vector.shape_cast %2 : vector<1x8x32xbf16> to vector<8x32xbf16>
    %c0_4 = arith.constant 0 : index
    %c0_5 = arith.constant 0 : index
    %c0_6 = arith.constant 0 : index
    %4 = vector.load %arg4[%c0_4, %c0_5, %c0_6] : memref<4x1x32xf32, #tpu.memory_space<vmem>>, vector<1x1x32xf32>
    %5 = vector.shape_cast %4 : vector<1x1x32xf32> to vector<1x32xf32>
    %cst = arith.constant dense<0.000000e+00> : vector<8x32xf32>
    %6 = tpu.matmul %1, %3, %cst {dimension_numbers = #tpu.dot_dimension_numbers<[1], [0], [0], [1], [0, 0, 1, 1], [], []>} : vector<8x8xbf16>, vector<8x32xbf16>, vector<8x32xf32> -> vector<8x32xf32>
    %7 = vector.broadcast %5 : vector<1x32xf32> to vector<8x32xf32>
    %8 = arith.addf %6, %7 : vector<8x32xf32>
    %9 = arith.negf %8 : vector<8x32xf32>
    %10 = math.exp %9 : vector<8x32xf32>
    %cst_7 = arith.constant 1.000000e+00 : f32
    %11 = vector.broadcast %cst_7 : f32 to vector<8x32xf32>
    %12 = arith.addf %11, %10 : vector<8x32xf32>
    %13 = arith.divf %11, %12 : vector<8x32xf32>
    %14 = arith.mulf %8, %13 : vector<8x32xf32>
    %15 = arith.truncf %14 : vector<8x32xf32> to vector<8x32xbf16>
    %c0_8 = arith.constant 0 : index
    %c0_9 = arith.constant 0 : index
    %c0_10 = arith.constant 0 : index
    %16 = vector.load %arg5[%c0_8, %c0_9, %c0_10] : memref<4x32x32xbf16, #tpu.memory_space<vmem>>, vector<1x32x32xbf16>
    %17 = vector.shape_cast %16 : vector<1x32x32xbf16> to vector<32x32xbf16>
    %c0_11 = arith.constant 0 : index
    %c0_12 = arith.constant 0 : index
    %c0_13 = arith.constant 0 : index
    %18 = vector.load %arg6[%c0_11, %c0_12, %c0_13] : memref<4x1x32xf32, #tpu.memory_space<vmem>>, vector<1x1x32xf32>
    %19 = vector.shape_cast %18 : vector<1x1x32xf32> to vector<1x32xf32>
    %cst_14 = arith.constant dense<0.000000e+00> : vector<8x32xf32>
    %20 = tpu.matmul %15, %17, %cst_14 {dimension_numbers = #tpu.dot_dimension_numbers<[1], [0], [0], [1], [0, 0, 1, 1], [], []>} : vector<8x32xbf16>, vector<32x32xbf16>, vector<8x32xf32> -> vector<8x32xf32>
    %21 = vector.broadcast %19 : vector<1x32xf32> to vector<8x32xf32>
    %22 = arith.addf %20, %21 : vector<8x32xf32>
    %23 = arith.negf %22 : vector<8x32xf32>
    %24 = math.exp %23 : vector<8x32xf32>
    %cst_15 = arith.constant 1.000000e+00 : f32
    %25 = vector.broadcast %cst_15 : f32 to vector<8x32xf32>
    %26 = arith.addf %25, %24 : vector<8x32xf32>
    %27 = arith.divf %25, %26 : vector<8x32xf32>
    %28 = arith.mulf %22, %27 : vector<8x32xf32>
    %29 = arith.truncf %28 : vector<8x32xf32> to vector<8x32xbf16>
    %c0_16 = arith.constant 0 : index
    %c0_17 = arith.constant 0 : index
    %c0_18 = arith.constant 0 : index
    %30 = vector.load %arg7[%c0_16, %c0_17, %c0_18] : memref<4x32x128xbf16, #tpu.memory_space<vmem>>, vector<1x32x128xbf16>
    %31 = vector.shape_cast %30 : vector<1x32x128xbf16> to vector<32x128xbf16>
    %c0_19 = arith.constant 0 : index
    %c0_20 = arith.constant 0 : index
    %c0_21 = arith.constant 0 : index
    %32 = vector.load %arg8[%c0_19, %c0_20, %c0_21] : memref<4x1x128xf32, #tpu.memory_space<vmem>>, vector<1x1x128xf32>
    %33 = vector.shape_cast %32 : vector<1x1x128xf32> to vector<1x128xf32>
    %cst_22 = arith.constant dense<0.000000e+00> : vector<8x128xf32>
    %34 = tpu.matmul %29, %31, %cst_22 {dimension_numbers = #tpu.dot_dimension_numbers<[1], [0], [0], [1], [0, 0, 1, 1], [], []>} : vector<8x32xbf16>, vector<32x128xbf16>, vector<8x128xf32> -> vector<8x128xf32>
    %35 = vector.broadcast %33 : vector<1x128xf32> to vector<8x128xf32>
    %36 = arith.addf %34, %35 : vector<8x128xf32>
    %c0_23 = arith.constant 0 : index
    %c0_24 = arith.constant 0 : index
    %c0_25 = arith.constant 0 : index
    %37 = vector.load %arg9[%c0_23, %c0_24, %c0_25] : memref<4x8x128xf32, #tpu.memory_space<vmem>>, vector<1x8x128xf32>
    %38 = vector.shape_cast %37 : vector<1x8x128xf32> to vector<8x128xf32>
    %39 = vector.shape_cast %36 : vector<8x128xf32> to vector<1x8x128xf32>
    tpu.vector_store %arg9[%c0_23, %c0_24, %c0_25], %39 {strides = array<i32>} : memref<4x8x128xf32, #tpu.memory_space<vmem>>, vector<1x8x128xf32>,
    %c1 = arith.constant 1 : index
    %c0_26 = arith.constant 0 : index
    %c0_27 = arith.constant 0 : index
    %40 = vector.load %arg3[%c1, %c0_26, %c0_27] : memref<4x8x32xbf16, #tpu.memory_space<vmem>>, vector<1x8x32xbf16>
    %41 = vector.shape_cast %40 : vector<1x8x32xbf16> to vector<8x32xbf16>
    %c1_28 = arith.constant 1 : index
    %c0_29 = arith.constant 0 : index
    %c0_30 = arith.constant 0 : index
    %42 = vector.load %arg4[%c1_28, %c0_29, %c0_30] : memref<4x1x32xf32, #tpu.memory_space<vmem>>, vector<1x1x32xf32>
    %43 = vector.shape_cast %42 : vector<1x1x32xf32> to vector<1x32xf32>
    %cst_31 = arith.constant dense<0.000000e+00> : vector<8x32xf32>
    %44 = tpu.matmul %1, %41, %cst_31 {dimension_numbers = #tpu.dot_dimension_numbers<[1], [0], [0], [1], [0, 0, 1, 1], [], []>} : vector<8x8xbf16>, vector<8x32xbf16>, vector<8x32xf32> -> vector<8x32xf32>
    %45 = vector.broadcast %43 : vector<1x32xf32> to vector<8x32xf32>
    %46 = arith.addf %44, %45 : vector<8x32xf32>
    %47 = arith.negf %46 : vector<8x32xf32>
    %48 = math.exp %47 : vector<8x32xf32>
    %cst_32 = arith.constant 1.000000e+00 : f32
    %49 = vector.broadcast %cst_32 : f32 to vector<8x32xf32>
    %50 = arith.addf %49, %48 : vector<8x32xf32>
    %51 = arith.divf %49, %50 : vector<8x32xf32>
    %52 = arith.mulf %46, %51 : vector<8x32xf32>
    %53 = arith.truncf %52 : vector<8x32xf32> to vector<8x32xbf16>
    %c1_33 = arith.constant 1 : index
    %c0_34 = arith.constant 0 : index
    %c0_35 = arith.constant 0 : index
    %54 = vector.load %arg5[%c1_33, %c0_34, %c0_35] : memref<4x32x32xbf16, #tpu.memory_space<vmem>>, vector<1x32x32xbf16>
    %55 = vector.shape_cast %54 : vector<1x32x32xbf16> to vector<32x32xbf16>
    %c1_36 = arith.constant 1 : index
    %c0_37 = arith.constant 0 : index
    %c0_38 = arith.constant 0 : index
    %56 = vector.load %arg6[%c1_36, %c0_37, %c0_38] : memref<4x1x32xf32, #tpu.memory_space<vmem>>, vector<1x1x32xf32>
    %57 = vector.shape_cast %56 : vector<1x1x32xf32> to vector<1x32xf32>
    %cst_39 = arith.constant dense<0.000000e+00> : vector<8x32xf32>
    %58 = tpu.matmul %53, %55, %cst_39 {dimension_numbers = #tpu.dot_dimension_numbers<[1], [0], [0], [1], [0, 0, 1, 1], [], []>} : vector<8x32xbf16>, vector<32x32xbf16>, vector<8x32xf32> -> vector<8x32xf32>
    %59 = vector.broadcast %57 : vector<1x32xf32> to vector<8x32xf32>
    %60 = arith.addf %58, %59 : vector<8x32xf32>
    %61 = arith.negf %60 : vector<8x32xf32>
    %62 = math.exp %61 : vector<8x32xf32>
    %cst_40 = arith.constant 1.000000e+00 : f32
    %63 = vector.broadcast %cst_40 : f32 to vector<8x32xf32>
    %64 = arith.addf %63, %62 : vector<8x32xf32>
    %65 = arith.divf %63, %64 : vector<8x32xf32>
    %66 = arith.mulf %60, %65 : vector<8x32xf32>
    %67 = arith.truncf %66 : vector<8x32xf32> to vector<8x32xbf16>
    %c1_41 = arith.constant 1 : index
    %c0_42 = arith.constant 0 : index
    %c0_43 = arith.constant 0 : index
    %68 = vector.load %arg7[%c1_41, %c0_42, %c0_43] : memref<4x32x128xbf16, #tpu.memory_space<vmem>>, vector<1x32x128xbf16>
    %69 = vector.shape_cast %68 : vector<1x32x128xbf16> to vector<32x128xbf16>
    %c1_44 = arith.constant 1 : index
    %c0_45 = arith.constant 0 : index
    %c0_46 = arith.constant 0 : index
    %70 = vector.load %arg8[%c1_44, %c0_45, %c0_46] : memref<4x1x128xf32, #tpu.memory_space<vmem>>, vector<1x1x128xf32>
    %71 = vector.shape_cast %70 : vector<1x1x128xf32> to vector<1x128xf32>
    %cst_47 = arith.constant dense<0.000000e+00> : vector<8x128xf32>
    %72 = tpu.matmul %67, %69, %cst_47 {dimension_numbers = #tpu.dot_dimension_numbers<[1], [0], [0], [1], [0, 0, 1, 1], [], []>} : vector<8x32xbf16>, vector<32x128xbf16>, vector<8x128xf32> -> vector<8x128xf32>
    %73 = vector.broadcast %71 : vector<1x128xf32> to vector<8x128xf32>
    %74 = arith.addf %72, %73 : vector<8x128xf32>
    %c1_48 = arith.constant 1 : index
    %c0_49 = arith.constant 0 : index
    %c0_50 = arith.constant 0 : index
    %75 = vector.load %arg9[%c1_48, %c0_49, %c0_50] : memref<4x8x128xf32, #tpu.memory_space<vmem>>, vector<1x8x128xf32>
    %76 = vector.shape_cast %75 : vector<1x8x128xf32> to vector<8x128xf32>
    %77 = vector.shape_cast %74 : vector<8x128xf32> to vector<1x8x128xf32>
    tpu.vector_store %arg9[%c1_48, %c0_49, %c0_50], %77 {strides = array<i32>} : memref<4x8x128xf32, #tpu.memory_space<vmem>>, vector<1x8x128xf32>,
    %c2 = arith.constant 2 : index
    %c0_51 = arith.constant 0 : index
    %c0_52 = arith.constant 0 : index
    %78 = vector.load %arg3[%c2, %c0_51, %c0_52] : memref<4x8x32xbf16, #tpu.memory_space<vmem>>, vector<1x8x32xbf16>
    %79 = vector.shape_cast %78 : vector<1x8x32xbf16> to vector<8x32xbf16>
    %c2_53 = arith.constant 2 : index
    %c0_54 = arith.constant 0 : index
    %c0_55 = arith.constant 0 : index
    %80 = vector.load %arg4[%c2_53, %c0_54, %c0_55] : memref<4x1x32xf32, #tpu.memory_space<vmem>>, vector<1x1x32xf32>
    %81 = vector.shape_cast %80 : vector<1x1x32xf32> to vector<1x32xf32>
    %cst_56 = arith.constant dense<0.000000e+00> : vector<8x32xf32>
    %82 = tpu.matmul %1, %79, %cst_56 {dimension_numbers = #tpu.dot_dimension_numbers<[1], [0], [0], [1], [0, 0, 1, 1], [], []>} : vector<8x8xbf16>, vector<8x32xbf16>, vector<8x32xf32> -> vector<8x32xf32>
    %83 = vector.broadcast %81 : vector<1x32xf32> to vector<8x32xf32>
    %84 = arith.addf %82, %83 : vector<8x32xf32>
    %85 = arith.negf %84 : vector<8x32xf32>
    %86 = math.exp %85 : vector<8x32xf32>
    %cst_57 = arith.constant 1.000000e+00 : f32
    %87 = vector.broadcast %cst_57 : f32 to vector<8x32xf32>
    %88 = arith.addf %87, %86 : vector<8x32xf32>
    %89 = arith.divf %87, %88 : vector<8x32xf32>
    %90 = arith.mulf %84, %89 : vector<8x32xf32>
    %91 = arith.truncf %90 : vector<8x32xf32> to vector<8x32xbf16>
    %c2_58 = arith.constant 2 : index
    %c0_59 = arith.constant 0 : index
    %c0_60 = arith.constant 0 : index
    %92 = vector.load %arg5[%c2_58, %c0_59, %c0_60] : memref<4x32x32xbf16, #tpu.memory_space<vmem>>, vector<1x32x32xbf16>
    %93 = vector.shape_cast %92 : vector<1x32x32xbf16> to vector<32x32xbf16>
    %c2_61 = arith.constant 2 : index
    %c0_62 = arith.constant 0 : index
    %c0_63 = arith.constant 0 : index
    %94 = vector.load %arg6[%c2_61, %c0_62, %c0_63] : memref<4x1x32xf32, #tpu.memory_space<vmem>>, vector<1x1x32xf32>
    %95 = vector.shape_cast %94 : vector<1x1x32xf32> to vector<1x32xf32>
    %cst_64 = arith.constant dense<0.000000e+00> : vector<8x32xf32>
    %96 = tpu.matmul %91, %93, %cst_64 {dimension_numbers = #tpu.dot_dimension_numbers<[1], [0], [0], [1], [0, 0, 1, 1], [], []>} : vector<8x32xbf16>, vector<32x32xbf16>, vector<8x32xf32> -> vector<8x32xf32>
    %97 = vector.broadcast %95 : vector<1x32xf32> to vector<8x32xf32>
    %98 = arith.addf %96, %97 : vector<8x32xf32>
    %99 = arith.negf %98 : vector<8x32xf32>
    %100 = math.exp %99 : vector<8x32xf32>
    %cst_65 = arith.constant 1.000000e+00 : f32
    %101 = vector.broadcast %cst_65 : f32 to vector<8x32xf32>
    %102 = arith.addf %101, %100 : vector<8x32xf32>
    %103 = arith.divf %101, %102 : vector<8x32xf32>
    %104 = arith.mulf %98, %103 : vector<8x32xf32>
    %105 = arith.truncf %104 : vector<8x32xf32> to vector<8x32xbf16>
    %c2_66 = arith.constant 2 : index
    %c0_67 = arith.constant 0 : index
    %c0_68 = arith.constant 0 : index
    %106 = vector.load %arg7[%c2_66, %c0_67, %c0_68] : memref<4x32x128xbf16, #tpu.memory_space<vmem>>, vector<1x32x128xbf16>
    %107 = vector.shape_cast %106 : vector<1x32x128xbf16> to vector<32x128xbf16>
    %c2_69 = arith.constant 2 : index
    %c0_70 = arith.constant 0 : index
    %c0_71 = arith.constant 0 : index
    %108 = vector.load %arg8[%c2_69, %c0_70, %c0_71] : memref<4x1x128xf32, #tpu.memory_space<vmem>>, vector<1x1x128xf32>
    %109 = vector.shape_cast %108 : vector<1x1x128xf32> to vector<1x128xf32>
    %cst_72 = arith.constant dense<0.000000e+00> : vector<8x128xf32>
    %110 = tpu.matmul %105, %107, %cst_72 {dimension_numbers = #tpu.dot_dimension_numbers<[1], [0], [0], [1], [0, 0, 1, 1], [], []>} : vector<8x32xbf16>, vector<32x128xbf16>, vector<8x128xf32> -> vector<8x128xf32>
    %111 = vector.broadcast %109 : vector<1x128xf32> to vector<8x128xf32>
    %112 = arith.addf %110, %111 : vector<8x128xf32>
    %c2_73 = arith.constant 2 : index
    %c0_74 = arith.constant 0 : index
    %c0_75 = arith.constant 0 : index
    %113 = vector.load %arg9[%c2_73, %c0_74, %c0_75] : memref<4x8x128xf32, #tpu.memory_space<vmem>>, vector<1x8x128xf32>
    %114 = vector.shape_cast %113 : vector<1x8x128xf32> to vector<8x128xf32>
    %115 = vector.shape_cast %112 : vector<8x128xf32> to vector<1x8x128xf32>
    tpu.vector_store %arg9[%c2_73, %c0_74, %c0_75], %115 {strides = array<i32>} : memref<4x8x128xf32, #tpu.memory_space<vmem>>, vector<1x8x128xf32>,
    %c3 = arith.constant 3 : index
    %c0_76 = arith.constant 0 : index
    %c0_77 = arith.constant 0 : index
    %116 = vector.load %arg3[%c3, %c0_76, %c0_77] : memref<4x8x32xbf16, #tpu.memory_space<vmem>>, vector<1x8x32xbf16>
    %117 = vector.shape_cast %116 : vector<1x8x32xbf16> to vector<8x32xbf16>
    %c3_78 = arith.constant 3 : index
    %c0_79 = arith.constant 0 : index
    %c0_80 = arith.constant 0 : index
    %118 = vector.load %arg4[%c3_78, %c0_79, %c0_80] : memref<4x1x32xf32, #tpu.memory_space<vmem>>, vector<1x1x32xf32>
    %119 = vector.shape_cast %118 : vector<1x1x32xf32> to vector<1x32xf32>
    %cst_81 = arith.constant dense<0.000000e+00> : vector<8x32xf32>
    %120 = tpu.matmul %1, %117, %cst_81 {dimension_numbers = #tpu.dot_dimension_numbers<[1], [0], [0], [1], [0, 0, 1, 1], [], []>} : vector<8x8xbf16>, vector<8x32xbf16>, vector<8x32xf32> -> vector<8x32xf32>
    %121 = vector.broadcast %119 : vector<1x32xf32> to vector<8x32xf32>
    %122 = arith.addf %120, %121 : vector<8x32xf32>
    %123 = arith.negf %122 : vector<8x32xf32>
    %124 = math.exp %123 : vector<8x32xf32>
    %cst_82 = arith.constant 1.000000e+00 : f32
    %125 = vector.broadcast %cst_82 : f32 to vector<8x32xf32>
    %126 = arith.addf %125, %124 : vector<8x32xf32>
    %127 = arith.divf %125, %126 : vector<8x32xf32>
    %128 = arith.mulf %122, %127 : vector<8x32xf32>
    %129 = arith.truncf %128 : vector<8x32xf32> to vector<8x32xbf16>
    %c3_83 = arith.constant 3 : index
    %c0_84 = arith.constant 0 : index
    %c0_85 = arith.constant 0 : index
    %130 = vector.load %arg5[%c3_83, %c0_84, %c0_85] : memref<4x32x32xbf16, #tpu.memory_space<vmem>>, vector<1x32x32xbf16>
    %131 = vector.shape_cast %130 : vector<1x32x32xbf16> to vector<32x32xbf16>
    %c3_86 = arith.constant 3 : index
    %c0_87 = arith.constant 0 : index
    %c0_88 = arith.constant 0 : index
    %132 = vector.load %arg6[%c3_86, %c0_87, %c0_88] : memref<4x1x32xf32, #tpu.memory_space<vmem>>, vector<1x1x32xf32>
    %133 = vector.shape_cast %132 : vector<1x1x32xf32> to vector<1x32xf32>
    %cst_89 = arith.constant dense<0.000000e+00> : vector<8x32xf32>
    %134 = tpu.matmul %129, %131, %cst_89 {dimension_numbers = #tpu.dot_dimension_numbers<[1], [0], [0], [1], [0, 0, 1, 1], [], []>} : vector<8x32xbf16>, vector<32x32xbf16>, vector<8x32xf32> -> vector<8x32xf32>
    %135 = vector.broadcast %133 : vector<1x32xf32> to vector<8x32xf32>
    %136 = arith.addf %134, %135 : vector<8x32xf32>
    %137 = arith.negf %136 : vector<8x32xf32>
    %138 = math.exp %137 : vector<8x32xf32>
    %cst_90 = arith.constant 1.000000e+00 : f32
    %139 = vector.broadcast %cst_90 : f32 to vector<8x32xf32>
    %140 = arith.addf %139, %138 : vector<8x32xf32>
    %141 = arith.divf %139, %140 : vector<8x32xf32>
    %142 = arith.mulf %136, %141 : vector<8x32xf32>
    %143 = arith.truncf %142 : vector<8x32xf32> to vector<8x32xbf16>
    %c3_91 = arith.constant 3 : index
    %c0_92 = arith.constant 0 : index
    %c0_93 = arith.constant 0 : index
    %144 = vector.load %arg7[%c3_91, %c0_92, %c0_93] : memref<4x32x128xbf16, #tpu.memory_space<vmem>>, vector<1x32x128xbf16>
    %145 = vector.shape_cast %144 : vector<1x32x128xbf16> to vector<32x128xbf16>
    %c3_94 = arith.constant 3 : index
    %c0_95 = arith.constant 0 : index
    %c0_96 = arith.constant 0 : index
    %146 = vector.load %arg8[%c3_94, %c0_95, %c0_96] : memref<4x1x128xf32, #tpu.memory_space<vmem>>, vector<1x1x128xf32>
    %147 = vector.shape_cast %146 : vector<1x1x128xf32> to vector<1x128xf32>
    %cst_97 = arith.constant dense<0.000000e+00> : vector<8x128xf32>
    %148 = tpu.matmul %143, %145, %cst_97 {dimension_numbers = #tpu.dot_dimension_numbers<[1], [0], [0], [1], [0, 0, 1, 1], [], []>} : vector<8x32xbf16>, vector<32x128xbf16>, vector<8x128xf32> -> vector<8x128xf32>
    %149 = vector.broadcast %147 : vector<1x128xf32> to vector<8x128xf32>
    %150 = arith.addf %148, %149 : vector<8x128xf32>
    %c3_98 = arith.constant 3 : index
    %c0_99 = arith.constant 0 : index
    %c0_100 = arith.constant 0 : index
    %151 = vector.load %arg9[%c3_98, %c0_99, %c0_100] : memref<4x8x128xf32, #tpu.memory_space<vmem>>, vector<1x8x128xf32>
    %152 = vector.shape_cast %151 : vector<1x8x128xf32> to vector<8x128xf32>
    %153 = vector.shape_cast %150 : vector<8x128xf32> to vector<1x8x128xf32>
    tpu.vector_store %arg9[%c3_98, %c0_99, %c0_100], %153 {strides = array<i32>} : memref<4x8x128xf32, #tpu.memory_space<vmem>>, vector<1x8x128xf32>,
    return
  }
  func.func @transform_0(%arg0: i32, %arg1: i32) -> (i32, i32) {
    %c0_i32 = arith.constant 0 : i32
    %c0_i32_0 = arith.constant 0 : i32
    return %arg1, %c0_i32 : i32, i32
  }
  func.func @transform_1(%arg0: i32, %arg1: i32) -> (i32, i32, i32) {
    %c0_i32 = arith.constant 0 : i32
    %c0_i32_0 = arith.constant 0 : i32
    %c0_i32_1 = arith.constant 0 : i32
    return %arg0, %c0_i32, %c0_i32_0 : i32, i32, i32
  }
  func.func @transform_2(%arg0: i32, %arg1: i32) -> (i32, i32, i32) {
    %c0_i32 = arith.constant 0 : i32
    %c0_i32_0 = arith.constant 0 : i32
    %c0_i32_1 = arith.constant 0 : i32
    return %arg0, %c0_i32, %c0_i32_0 : i32, i32, i32
  }
  func.func @transform_3(%arg0: i32, %arg1: i32) -> (i32, i32, i32) {
    %c0_i32 = arith.constant 0 : i32
    %c0_i32_0 = arith.constant 0 : i32
    %c0_i32_1 = arith.constant 0 : i32
    return %arg0, %c0_i32, %c0_i32_0 : i32, i32, i32
  }
  func.func @transform_4(%arg0: i32, %arg1: i32) -> (i32, i32, i32) {
    %c0_i32 = arith.constant 0 : i32
    %c0_i32_0 = arith.constant 0 : i32
    %c0_i32_1 = arith.constant 0 : i32
    return %arg0, %c0_i32, %c0_i32_0 : i32, i32, i32
  }
  func.func @transform_5(%arg0: i32, %arg1: i32) -> (i32, i32, i32) {
    %c0_i32 = arith.constant 0 : i32
    %c0_i32_0 = arith.constant 0 : i32
    %c0_i32_1 = arith.constant 0 : i32
    return %arg0, %c0_i32, %c0_i32_0 : i32, i32, i32
  }
  func.func @transform_6(%arg0: i32, %arg1: i32) -> (i32, i32, i32) {
    %c0_i32 = arith.constant 0 : i32
    %c0_i32_0 = arith.constant 0 : i32
    %c0_i32_1 = arith.constant 0 : i32
    return %arg0, %c0_i32, %c0_i32_0 : i32, i32, i32
  }
  func.func @transform_7(%arg0: i32, %arg1: i32) -> (i32, i32, i32) {
    %c0_i32 = arith.constant 0 : i32
    %c0_i32_0 = arith.constant 0 : i32
    return %arg0, %arg1, %c0_i32 : i32, i32, i32
  }
}

</mosaic_0001>

<bundles_post_ra>
// kernel: tpu_custom_call.1
= control target key start
LH: loop header
LB: loop body
LE: loop exit
PB: predicated region body
PF: predicated region fallthrough
CT: control target
= control target key end

     0   :  { %12 = vsyncpa [#allocation3], 0  ;;  %s1505_s0 = inlined_call_operand.hbm [shape: f32[8,8], index: 0, kind: input, shape index: {}]   ;;  %s1506_s1 = inlined_call_operand.hbm [shape: bf16[4,8,32], index: 1, kind: input, shape index: {}]   ;;  %s1507_s2 = inlined_call_operand.vmem [shape: f32[4,1,32], index: 2, kind: input, shape index: {}]   ;;  %s1508_s3 = inlined_call_operand.hbm [shape: bf16[4,32,32], index: 3, kind: input, shape index: {}]   ;;  %s1509_s4 = inlined_call_operand.vmem [shape: f32[4,1,32], index: 4, kind: input, shape index: {}]   ;;  %s1510_s5 = inlined_call_operand.hbm [shape: bf16[4,32,128], index: 5, kind: input, shape index: {}]   ;;  %s1511_s6 = inlined_call_operand.vmem [shape: f32[4,1,128], index: 6, kind: input, shape index: {}]   ;;  %s1512_s7 = inlined_call_operand.hbm [shape: f32[4,8,128], index: 7, kind: output, shape index: {}]  }
   0x1   :  { %13 = vsyncpa [#allocation6], 0 }
   0x2   :  { %14 = vsyncpa [#allocation9], 0 }
   0x3   :  { %15 = vsyncpa [#allocation4], 0  ;;  %s1283_s24 = smov [#allocation5]   ;;  %s1165_s28 = scalar_lea.hbm %s1506_s1, 256 }
   0x4   :  { %s31_s25 = sshll.u32 %s1283_s24, 4  ;;  %p1166_p0 = scmp.ne.s32.totalorder %s1506_s1, %s1165_s28  ;;  %s32_s25 = int_to_ptr.vmem [resolvable:$true] %s31_s25 }
   0x5   :  { %p1169_p1 = scmp.lt.u32.totalorder %s1165_s28, %s1506_s1 }
   0x7   :  { %p1171_p2 = pnand %p1169_p1, %p1166_p0 }
   0x9   :  { %1174 = shalt.err (!%p1171_p2)
}
   0xa   :  { %s1175_s10 = scalar_lea.vmem %s32_s25, 256  ;;  %p1180_p4 = scmp.lt.s32.totalorder %s32_s25, %s32_s25 }
   0xb   :  { %p1176_p3 = scmp.ne.s32.totalorder %s32_s25, %s1175_s10  ;;  %p1181_p5 = scmp.lt.s32.totalorder %s1175_s10, %s1175_s10 }
   0xd   :  { %p1182_p6 = por %p1181_p5, %p1180_p4 }
   0xf   :  { %p1183_p7 = pnand %p1182_p6, %p1176_p3 }
  0x11   :  { %1186 = shalt.err (!%p1183_p7)
}
  0x12   :  { %s1284_s11 = smov 64   ;;  %s1285_s12 = smov 4  }
  0x13   :  { %37 = dma.hbm_to_vmem [thread:$0]  %s1506_s1, 256, %s32_s25, [#allocation6], %s1284_s11, %s1284_s11, %s1285_s12  }
  0x14   :  { %s1286_s15 = smov [#allocation2]   ;;  %s1287_s17 = smov [#allocation7]  }
  0x15   :  { %s22_s16 = sshll.u32 %s1286_s15, 4  ;;  %s45_s18 = sshll.u32 %s1287_s17, 4  ;;  %s23_s16 = int_to_ptr.vmem [resolvable:$true] %s22_s16  ;;  %s46_s18 = int_to_ptr.vmem [resolvable:$true] %s45_s18 }
  0x16   :  { %s1187_s21 = scalar_lea.hbm %s1505_s0, 128 }
  0x17   :  { %p1188_p8 = scmp.ne.s32.totalorder %s1505_s0, %s1187_s21  ;;  %p1191_p9 = scmp.lt.u32.totalorder %s1187_s21, %s1505_s0 }
  0x19   :  { %p1193_p10 = pnand %p1191_p9, %p1188_p8 }
  0x1b   :  { %1196 = shalt.err (!%p1193_p10)
}
  0x1c   :  { %s1197_s1 = scalar_lea.vmem %s23_s16, 128  ;;  %p1202_p12 = scmp.lt.s32.totalorder %s23_s16, %s23_s16 }
  0x1d   :  { %p1198_p11 = scmp.ne.s32.totalorder %s23_s16, %s1197_s1  ;;  %p1203_p13 = scmp.lt.s32.totalorder %s1197_s1, %s1197_s1 }
  0x1f   :  { %p1204_p0 = por %p1203_p13, %p1202_p12 }
  0x21   :  { %p1205_p1 = pnand %p1204_p0, %p1198_p11 }
  0x23   :  { %1208 = shalt.err (!%p1205_p1)
}
  0x24   :  { %25 = dma.hbm_to_vmem [thread:$0]  %s1505_s0, 128, %s23_s16, [#allocation3]  }
  0x25   :  { %s1209_s30 = scalar_lea.hbm %s1508_s3, 1024 }
  0x26   :  { %p1210_p2 = scmp.ne.s32.totalorder %s1508_s3, %s1209_s30  ;;  %p1213_p3 = scmp.lt.u32.totalorder %s1209_s30, %s1508_s3 }
  0x28   :  { %p1215_p4 = pnand %p1213_p3, %p1210_p2 }
  0x2a   :  { %1218 = shalt.err (!%p1215_p4)
}
  0x2b   :  { %s1219_s14 = scalar_lea.vmem %s46_s18, 1024  ;;  %p1224_p6 = scmp.lt.s32.totalorder %s46_s18, %s46_s18 }
  0x2c   :  { %p1220_p5 = scmp.ne.s32.totalorder %s46_s18, %s1219_s14  ;;  %p1225_p7 = scmp.lt.s32.totalorder %s1219_s14, %s1219_s14 }
  0x2e   :  { %p1226_p8 = por %p1225_p7, %p1224_p6 }
  0x30   :  { %p1227_p9 = pnand %p1226_p8, %p1220_p5 }
  0x32   :  { %1230 = shalt.err (!%p1227_p9)
}
  0x33   :  { %51 = dma.hbm_to_vmem [thread:$0]  %s1508_s3, 1024, %s46_s18, [#allocation6], %s1284_s11, %s1284_s11, %s1285_s12  }
  0x34   :  { %s1288_s16 = smov [#allocation8]   ;;  %s1231_s21 = scalar_lea.hbm %s1510_s5, 1024 }
  0x35   :  { %s59_s17 = sshll.u32 %s1288_s16, 4  ;;  %p1232_p10 = scmp.ne.s32.totalorder %s1510_s5, %s1231_s21  ;;  %s60_s17 = int_to_ptr.vmem [resolvable:$true] %s59_s17 }
  0x36   :  { %p1235_p11 = scmp.lt.u32.totalorder %s1231_s21, %s1510_s5 }
  0x38   :  { %p1237_p12 = pnand %p1235_p11, %p1232_p10 }
  0x3a   :  { %1240 = shalt.err (!%p1237_p12)
}
  0x3b   :  { %s1241_s1 = scalar_lea.vmem %s60_s17, 1024  ;;  %p1246_p0 = scmp.lt.s32.totalorder %s60_s17, %s60_s17 }
  0x3c   :  { %p1242_p13 = scmp.ne.s32.totalorder %s60_s17, %s1241_s1  ;;  %p1247_p1 = scmp.lt.s32.totalorder %s1241_s1, %s1241_s1 }
  0x3e   :  { %p1248_p2 = por %p1247_p1, %p1246_p0 }
  0x40   :  { %p1249_p3 = pnand %p1248_p2, %p1242_p13 }
  0x42   :  { %1252 = shalt.err (!%p1249_p3)
}
  0x43   :  { %65 = dma.hbm_to_vmem [thread:$0]  %s1510_s5, 1024, %s60_s17, [#allocation9], %s1284_s11, %s1284_s11, %s1285_s12  }
  0x44   :  { %1275 = dma.done.wait [#allocation3], 128  }
  0x45   :  { %1276 = vsyncadd [#allocation3], 4294967168 }
  0x46   :  { %1277 = dma.done.wait [#allocation6], 1280  }
  0x47   :  { %1278 = vsyncadd [#allocation6], 4294966016 }
  0x48   :  { %1279 = dma.done.wait [#allocation9], 1024  }
  0x49   :  { %1280 = vsyncadd [#allocation9], 4294966272  ;;  %v1289_v0 = vmov 0.0   ;;  %vm1290_vm0 = vmmov 0   ;;  %vm95_vm1 = vcmask 1043456   ;;  %v81_v2 = vld [vmem:[#allocation2] sm:$0xff] }
  0x4a   :  { %1018 = vmatprep.subr.bf16.mxu0 %v1289_v0  ;;  %1020 = vmatprep.mubr.msk.bf16.mxu0 %vm1290_vm0, %v1289_v0  ;;  %v83_v1 = vld [vmem:[#allocation5] sm:$0xf]  ;;  %v1398_v4 = vpack.c.bf16 %v81_v2, %v81_v2  ;;  %vm91_vm2 = vcmask 64512   ;;  %v1117_v5 = vld [vmem:[#allocation7] sm:$0xff]   ;;  %v1118_v6 = vld [vmem:[#allocation7 + $0x8] sm:$0xff]   ;;  %vm170_vm3 = vcmask 261120  }
  0x4b   :  { %1024 = vmatprep.subr.bf16.mxu1 %v1289_v0  ;;  %1028 = vmatprep.mubr.msk.bf16.mxu1 %vm1290_vm0, %v1289_v0  ;;  %v97_v3 = vsel %vm95_vm1, %v83_v1, 0  ;;  %v929_v7 = vld [vmem:[%s1507_s2] ss:$0 sm:$0xff]  ;;  %v290_v17 = vld [vmem:[#allocation5 + $0x4] sm:$0xf]  ;;  %v1119_v21 = vld [vmem:[#allocation8] sm:$0xff]  }
  0x4c   :  { %1019 = vmatpush3.bf16.msra.mxu0 %v97_v3  ;;  %1025 = vmatpush3.bf16.msra.mxu1 %v1117_v5  ;;  %v300_v20 = vsel %vm95_vm1, %v290_v17, 0  ;;  %v1120_v22 = vld [vmem:[#allocation8 + $0x8] sm:$0xff]   ;;  %v1121_v43 = vld [vmem:[#allocation7 + $0x10] sm:$0xff]   ;;  %v1122_v45 = vld [vmem:[#allocation7 + $0x18] sm:$0xff]   ;;  %s1291_s23 = smov [#allocation10]  }
  0x4d   :  { %1032 = vmatprep.subr.bf16.mxu0 %v1289_v0  ;;  %1026 = vmatprep.subr.bf16.mxu1 %v1289_v0  ;;  %v932_v23 = vld [vmem:[%s1509_s4] ss:$0 sm:$0xff]  ;;  %v942_v30 = vld [vmem:[%s1507_s2 + $0x1] ss:$0 sm:$0xff]  ;;  %v497_v47 = vld [vmem:[#allocation5 + $0x8] sm:$0xf] }
  0x4e   :  { %v507_v50 = vsel %vm95_vm1, %v497_v47, 0  ;;  %v1123_v51 = vld [vmem:[#allocation8 + $0x10] sm:$0xff]   ;;  %v1124_v52 = vld [vmem:[#allocation8 + $0x18] sm:$0xff]   ;;  %v937_v53 = vld [vmem:[%s1511_s6] ss:$0 sm:$0xff]  ;;  %s915_s24 = sshll.u32 %s1291_s23, 4  ;;  %s916_s24 = int_to_ptr.vmem [resolvable:$true] %s915_s24 }
  0x4f   :  { %1021 = vmatmul.mubr.msk.bf16.vlgmr.msra.gmra.mrb[0].mxu0 %vm91_vm2, %v1398_v4  ;;  %v946_v59 = vld [vmem:[%s1509_s4 + $0x1] ss:$0 sm:$0xff]  ;;  %v957_v3 = vld [vmem:[%s1507_s2 + $0x2] ss:$0 sm:$0xff]  ;;  %v1125_v17 = vld [vmem:[#allocation7 + $0x20] sm:$0xff]   ;;  %p1258_p5 = scmp.lt.s32.totalorder %s916_s24, %s916_s24 }
  0x50   :  { %1036 = vmatprep.mubr.msk.bf16.mxu0 %vm1290_vm0, %v1289_v0  ;;  %1027 = vmatpush3.bf16.msra.mxu1 %v1118_v6 }
  0x51   :  { %1040 = vmatprep.subr.bf16.mxu1 %v1289_v0  ;;  %1033 = vmatpush3.bf16.msra.mxu0 %v1119_v21  ;;  %v704_v21 = vld [vmem:[#allocation5 + $0xc] sm:$0xf] }
  0x52   :  { %1034 = vmatprep.subr.bf16.mxu0 %v1289_v0 }
  0x55   :  { %1035 = vmatpush3.bf16.msra.mxu0 %v1120_v22 }
  0x56   :  { %1046 = vmatprep.subr.bf16.mxu0 %v1289_v0 }
 0x122   :  { %v133_v8 = vpop.f32.mrb[0].mxu0 }
 0x123   :  { %v134_v9 = vadd.f32 %v929_v7, %v133_v8  ;;  %v1022_v10 = vpop.f32.mrb[1].mxu0 }
 0x124   :  { %v136_v11 = vpop.f32.mrb[2].mxu0 }
 0x125   :  { %v931_v12 = vmul.f32 -1.442695, %v134_v9  ;;  %v1023_v13 = vpop.f32.mrb[3].mxu0 }
 0x127   :  { %1133 = vpow2.f32 %v931_v12 }
 0x131   :  { %v1134_v14 = vpop.eup %1133 }
 0x132   :  { %v142_v15 = vadd.f32 1.0, %v1134_v14 }
 0x134   :  { %1135 = vrcp.f32 %v142_v15 }
 0x13e   :  { %v1136_v16 = vpop.eup %1135 }
 0x13f   :  { %v145_v18 = vmul.f32 %v1136_v16, %v134_v9 }
 0x141   :  { %v146_v19 = vpack.c.bf16 %v145_v18, %v145_v18 }
 0x143   :  { %1029 = vmatmul.mubr.msk.bf16.vlgmr.msra.gmra.mrb[0].mxu1 %vm170_vm3, %v146_v19  ;;  %v1126_v19 = vld [vmem:[#allocation7 + $0x28] sm:$0xff]  }
 0x144   :  { %1041 = vmatpush3.bf16.msra.mxu1 %v300_v20  ;;  %1042 = vmatprep.mubr.msk.bf16.mxu1 %vm1290_vm0, %v1289_v0 }
 0x145   :  { %1054 = vmatprep.subr.bf16.mxu1 %v1289_v0 }
 0x14b   :  { %1043 = vmatmul.mubr.msk.bf16.vlgmr.msra.gmra.mrb[4].mxu1 %vm91_vm2, %v1398_v4 }
 0x14c   :  { %1058 = vmatprep.mubr.msk.bf16.mxu1 %vm1290_vm0, %v1289_v0  ;;  %1055 = vmatpush3.bf16.msra.mxu1 %v1123_v51 }
 0x14d   :  { %1056 = vmatprep.subr.bf16.mxu1 %v1289_v0 }
 0x150   :  { %1057 = vmatpush3.bf16.msra.mxu1 %v1124_v52  ;;  %v1129_v52 = vld [vmem:[#allocation7 + $0x30] sm:$0xff]  }
 0x151   :  { %1068 = vmatprep.subr.bf16.mxu1 %v1289_v0 }
 0x216   :  { %v208_v24 = vpop.f32.mrb[0].mxu1 }
 0x217   :  { %v209_v25 = vadd.f32 %v932_v23, %v208_v24  ;;  %v1030_v26 = vpop.f32.mrb[1].mxu1  ;;  %v714_v24 = vsel %vm95_vm1, %v704_v21, 0 }
 0x218   :  { %v211_v27 = vpop.f32.mrb[2].mxu1  ;;  %v1128_v26 = vld [vmem:[#allocation8 + $0x28] sm:$0xff]  }
 0x219   :  { %v936_v28 = vmul.f32 -1.442695, %v209_v25  ;;  %v1031_v29 = vpop.f32.mrb[3].mxu1  ;;  %v952_v27 = vld [vmem:[%s1511_s6 + $0x1] ss:$0 sm:$0xff] }
 0x21b   :  { %1137 = vpow2.f32 %v936_v28 }
 0x21e   :  { %v336_v31 = vpop.f32.mrb[4].mxu1 }
 0x21f   :  { %v337_v32 = vadd.f32 %v942_v30, %v336_v31  ;;  %v1044_v33 = vpop.f32.mrb[5].mxu1 }
 0x220   :  { %v339_v34 = vpop.f32.mrb[6].mxu1 }
 0x221   :  { %v944_v35 = vmul.f32 -1.442695, %v337_v32  ;;  %v1045_v36 = vpop.f32.mrb[7].mxu1 }
 0x223   :  { %1139 = vpow2.f32 %v944_v35 }
 0x225   :  { %v1138_v37 = vpop.eup %1137 }
 0x226   :  { %v217_v38 = vadd.f32 1.0, %v1138_v37 }
 0x228   :  { %1141 = vrcp.f32 %v217_v38 }
 0x22d   :  { %v1140_v39 = vpop.eup %1139 }
 0x22e   :  { %v345_v40 = vadd.f32 1.0, %v1140_v39  ;;  %v972_v39 = vld [vmem:[%s1507_s2 + $0x3] ss:$0 sm:$0xff] }
 0x230   :  { %1143 = vrcp.f32 %v345_v40 }
 0x232   :  { %v1142_v41 = vpop.eup %1141 }
 0x233   :  { %v220_v42 = vmul.f32 %v1142_v41, %v209_v25  ;;  %v1127_v25 = vld [vmem:[#allocation8 + $0x20] sm:$0xff]  }
 0x235   :  { %v221_v44 = vpack.c.bf16 %v220_v42, %v220_v42 }
 0x237   :  { %1037 = vmatmul.mubr.msk.bf16.vlgmr.msra.gmra.mrb[4].mxu0 %vm170_vm3, %v221_v44 }
 0x238   :  { %1047 = vmatpush3.bf16.msra.mxu0 %v1121_v43  ;;  %1050 = vmatprep.mubr.msk.bf16.mxu0 %vm1290_vm0, %v1289_v0 }
 0x239   :  { %1048 = vmatprep.subr.bf16.mxu0 %v1289_v0 }
 0x23a   :  { %v1144_v46 = vpop.eup %1143 }
 0x23b   :  { %v348_v48 = vmul.f32 %v1144_v46, %v337_v32  ;;  %v961_v32 = vld [vmem:[%s1509_s4 + $0x2] ss:$0 sm:$0xff] }
 0x23c   :  { %1049 = vmatpush3.bf16.msra.mxu0 %v1122_v45 }
 0x23d   :  { %v349_v49 = vpack.c.bf16 %v348_v48, %v348_v48  ;;  %1062 = vmatprep.subr.bf16.mxu0 %v1289_v0 }
 0x23f   :  { %1051 = vmatmul.mubr.msk.bf16.vlgmr.msra.gmra.mrb[8].mxu0 %vm170_vm3, %v349_v49 }
 0x240   :  { %1063 = vmatpush3.bf16.msra.mxu0 %v507_v50  ;;  %1064 = vmatprep.mubr.msk.bf16.mxu0 %vm1290_vm0, %v1289_v0 }
 0x241   :  { %1076 = vmatprep.subr.bf16.mxu0 %v1289_v0 }
 0x247   :  { %1065 = vmatmul.mubr.msk.bf16.vlgmr.msra.gmra.mrb[12].mxu0 %vm91_vm2, %v1398_v4 }
 0x248   :  { %1080 = vmatprep.mubr.msk.bf16.mxu0 %vm1290_vm0, %v1289_v0  ;;  %1077 = vmatpush3.bf16.msra.mxu0 %v1127_v25 }
 0x249   :  { %1078 = vmatprep.subr.bf16.mxu0 %v1289_v0 }
 0x24c   :  { %1079 = vmatpush3.bf16.msra.mxu0 %v1128_v26 }
 0x24d   :  { %1090 = vmatprep.subr.bf16.mxu0 %v1289_v0 }
 0x30a   :  { %v282_v54 = vpop.f32.mrb[4].mxu0 }
 0x30b   :  { %v283_v55 = vadd.f32 %v937_v53, %v282_v54  ;;  %v1038_v56 = vpop.f32.mrb[5].mxu0  ;;  %v1130_v54 = vld [vmem:[#allocation7 + $0x38] sm:$0xff]  }
 0x30c   :  { %v285_v57 = vpop.f32.mrb[6].mxu0 }
 0x30d   :  { %288 = vst [vmem:[#allocation10] sm:$0xff] %v283_v55  ;;  %v1039_v58 = vpop.f32.mrb[7].mxu0 }
 0x30e   :  { %v1131_v58 = vld [vmem:[#allocation8 + $0x30] sm:$0xff]  }
 0x312   :  { %v412_v60 = vpop.f32.mrb[8].mxu0 }
 0x313   :  { %v413_v61 = vadd.f32 %v946_v59, %v412_v60  ;;  %v1052_v62 = vpop.f32.mrb[9].mxu0  ;;  %v1132_v59 = vld [vmem:[#allocation8 + $0x38] sm:$0xff]   ;;  %v967_v60 = vld [vmem:[%s1511_s6 + $0x2] ss:$0 sm:$0xff] }
 0x314   :  { %v415_v63 = vpop.f32.mrb[10].mxu0 }
 0x315   :  { %v950_v1 = vmul.f32 -1.442695, %v413_v61  ;;  %v1053_v2 = vpop.f32.mrb[11].mxu0 }
 0x317   :  { %1145 = vpow2.f32 %v950_v1 }
 0x31a   :  { %v543_v5 = vpop.f32.mrb[12].mxu0 }
 0x31b   :  { %v544_v6 = vadd.f32 %v957_v3, %v543_v5  ;;  %v1066_v7 = vpop.f32.mrb[13].mxu0  ;;  %v976_v3 = vld [vmem:[%s1509_s4 + $0x3] ss:$0 sm:$0xff]  ;;  %s1253_s4 = scalar_lea.vmem %s916_s24, 512 }
 0x31c   :  { %v546_v8 = vpop.f32.mrb[14].mxu0  ;;  %p1254_p4 = scmp.ne.s32.totalorder %s916_s24, %s1253_s4  ;;  %p1259_p6 = scmp.lt.s32.totalorder %s1253_s4, %s1253_s4 }
 0x31d   :  { %v959_v9 = vmul.f32 -1.442695, %v544_v6  ;;  %v1067_v10 = vpop.f32.mrb[15].mxu0 }
 0x31e   :  { %p1260_p7 = por %p1259_p6, %p1258_p5 }
 0x31f   :  { %1147 = vpow2.f32 %v959_v9 }
 0x320   :  { %p1261_p8 = pnand %p1260_p7, %p1254_p4 }
 0x321   :  { %v1146_v11 = vpop.eup %1145 }
 0x322   :  { %v421_v12 = vadd.f32 1.0, %v1146_v11 }
 0x324   :  { %1149 = vrcp.f32 %v421_v12 }
 0x329   :  { %v1148_v13 = vpop.eup %1147 }
 0x32a   :  { %v552_v14 = vadd.f32 1.0, %v1148_v13 }
 0x32c   :  { %1151 = vrcp.f32 %v552_v14 }
 0x32e   :  { %v1150_v15 = vpop.eup %1149 }
 0x32f   :  { %v424_v16 = vmul.f32 %v1150_v15, %v413_v61  ;;  %v982_v15 = vld [vmem:[%s1511_s6 + $0x3] ss:$0 sm:$0xff] }
 0x331   :  { %v425_v18 = vpack.c.bf16 %v424_v16, %v424_v16 }
 0x333   :  { %1059 = vmatmul.mubr.msk.bf16.vlgmr.msra.gmra.mrb[8].mxu1 %vm170_vm3, %v425_v18 }
 0x334   :  { %1069 = vmatpush3.bf16.msra.mxu1 %v1125_v17  ;;  %1072 = vmatprep.mubr.msk.bf16.mxu1 %vm1290_vm0, %v1289_v0 }
 0x335   :  { %1070 = vmatprep.subr.bf16.mxu1 %v1289_v0 }
 0x336   :  { %v1152_v20 = vpop.eup %1151 }
 0x337   :  { %v555_v22 = vmul.f32 %v1152_v20, %v544_v6 }
 0x338   :  { %1071 = vmatpush3.bf16.msra.mxu1 %v1126_v19 }
 0x339   :  { %v556_v23 = vpack.c.bf16 %v555_v22, %v555_v22  ;;  %1084 = vmatprep.subr.bf16.mxu1 %v1289_v0 }
 0x33b   :  { %1073 = vmatmul.mubr.msk.bf16.vlgmr.msra.gmra.mrb[12].mxu1 %vm170_vm3, %v556_v23 }
 0x33c   :  { %1085 = vmatpush3.bf16.msra.mxu1 %v714_v24  ;;  %1086 = vmatprep.mubr.msk.bf16.mxu1 %vm1290_vm0, %v1289_v0 }
 0x33d   :  { %1098 = vmatprep.subr.bf16.mxu1 %v1289_v0 }
 0x343   :  { %1087 = vmatmul.mubr.msk.bf16.vlgmr.msra.gmra.mrb[16].mxu1 %vm91_vm2, %v1398_v4 }
 0x344   :  { %1102 = vmatprep.mubr.msk.bf16.mxu1 %vm1290_vm0, %v1289_v0  ;;  %1099 = vmatpush3.bf16.msra.mxu1 %v1131_v58 }
 0x345   :  { %1100 = vmatprep.subr.bf16.mxu1 %v1289_v0 }
 0x348   :  { %1101 = vmatpush3.bf16.msra.mxu1 %v1132_v59 }
 0x406   :  { %v488_v28 = vpop.f32.mrb[8].mxu1 }
 0x407   :  { %v489_v29 = vadd.f32 %v952_v27, %v488_v28  ;;  %v1060_v30 = vpop.f32.mrb[9].mxu1 }
 0x408   :  { %v491_v31 = vpop.f32.mrb[10].mxu1 }
 0x409   :  { %495 = vst [vmem:[#allocation10 + $0x8] sm:$0xff] %v489_v29  ;;  %v1061_v4 = vpop.f32.mrb[11].mxu1 }
 0x40e   :  { %v619_v33 = vpop.f32.mrb[12].mxu1 }
 0x40f   :  { %v620_v34 = vadd.f32 %v961_v32, %v619_v33  ;;  %v1074_v35 = vpop.f32.mrb[13].mxu1 }
 0x410   :  { %v622_v36 = vpop.f32.mrb[14].mxu1 }
 0x411   :  { %v965_v37 = vmul.f32 -1.442695, %v620_v34  ;;  %v1075_v38 = vpop.f32.mrb[15].mxu1 }
 0x413   :  { %1153 = vpow2.f32 %v965_v37 }
 0x416   :  { %v750_v40 = vpop.f32.mrb[16].mxu1 }
 0x417   :  { %v751_v41 = vadd.f32 %v972_v39, %v750_v40  ;;  %v1088_v42 = vpop.f32.mrb[17].mxu1 }
 0x418   :  { %v753_v43 = vpop.f32.mrb[18].mxu1 }
 0x419   :  { %v974_v44 = vmul.f32 -1.442695, %v751_v41  ;;  %v1089_v45 = vpop.f32.mrb[19].mxu1 }
 0x41b   :  { %1155 = vpow2.f32 %v974_v44 }
 0x41d   :  { %v1154_v46 = vpop.eup %1153 }
 0x41e   :  { %v628_v47 = vadd.f32 1.0, %v1154_v46 }
 0x420   :  { %1157 = vrcp.f32 %v628_v47 }
 0x425   :  { %v1156_v48 = vpop.eup %1155 }
 0x426   :  { %v759_v49 = vadd.f32 1.0, %v1156_v48 }
 0x428   :  { %1159 = vrcp.f32 %v759_v49 }
 0x42a   :  { %v1158_v50 = vpop.eup %1157 }
 0x42b   :  { %v631_v51 = vmul.f32 %v1158_v50, %v620_v34 }
 0x42d   :  { %v632_v53 = vpack.c.bf16 %v631_v51, %v631_v51 }
 0x42f   :  { %1081 = vmatmul.mubr.msk.bf16.vlgmr.msra.gmra.mrb[16].mxu0 %vm170_vm3, %v632_v53 }
 0x430   :  { %1091 = vmatpush3.bf16.msra.mxu0 %v1129_v52  ;;  %1094 = vmatprep.mubr.msk.bf16.mxu0 %vm1290_vm0, %v1289_v0 }
 0x431   :  { %1092 = vmatprep.subr.bf16.mxu0 %v1289_v0 }
 0x432   :  { %v1160_v55 = vpop.eup %1159 }
 0x433   :  { %v762_v56 = vmul.f32 %v1160_v55, %v751_v41 }
 0x434   :  { %1093 = vmatpush3.bf16.msra.mxu0 %v1130_v54 }
 0x435   :  { %v763_v57 = vpack.c.bf16 %v762_v56, %v762_v56 }
 0x437   :  { %1095 = vmatmul.mubr.msk.bf16.vlgmr.msra.gmra.mrb[20].mxu0 %vm170_vm3, %v763_v57 }
 0x502   :  { %v695_v61 = vpop.f32.mrb[16].mxu0 }
 0x503   :  { %v696_v62 = vadd.f32 %v967_v60, %v695_v61  ;;  %v1082_v63 = vpop.f32.mrb[17].mxu0 }
 0x504   :  { %v698_v1 = vpop.f32.mrb[18].mxu0 }
 0x505   :  { %702 = vst [vmem:[#allocation10 + $0x10] sm:$0xff] %v696_v62  ;;  %v1083_v2 = vpop.f32.mrb[19].mxu0 }
 0x50a   :  { %v826_v5 = vpop.f32.mrb[20].mxu0 }
 0x50b   :  { %v827_v6 = vadd.f32 %v976_v3, %v826_v5  ;;  %v1096_v7 = vpop.f32.mrb[21].mxu0 }
 0x50c   :  { %v829_v0 = vpop.f32.mrb[22].mxu0 }
 0x50d   :  { %v980_v8 = vmul.f32 -1.442695, %v827_v6  ;;  %v1097_v9 = vpop.f32.mrb[23].mxu0 }
 0x50f   :  { %1161 = vpow2.f32 %v980_v8 }
 0x519   :  { %v1162_v10 = vpop.eup %1161 }
 0x51a   :  { %v835_v11 = vadd.f32 1.0, %v1162_v10 }
 0x51c   :  { %1163 = vrcp.f32 %v835_v11 }
 0x526   :  { %v1164_v12 = vpop.eup %1163 }
 0x527   :  { %v838_v13 = vmul.f32 %v1164_v12, %v827_v6 }
 0x529   :  { %v839_v14 = vpack.c.bf16 %v838_v13, %v838_v13 }
 0x52b   :  { %1103 = vmatmul.mubr.msk.bf16.vlgmr.msra.gmra.mrb[20].mxu1 %vm170_vm3, %v839_v14 }
 0x5fe   :  { %v902_v16 = vpop.f32.mrb[20].mxu1 }
 0x5ff   :  { %v903_v17 = vadd.f32 %v982_v15, %v902_v16  ;;  %v1104_v18 = vpop.f32.mrb[21].mxu1 }
 0x600   :  { %v905_v19 = vpop.f32.mrb[22].mxu1 }
 0x601   :  { %909 = vst [vmem:[#allocation10 + $0x18] sm:$0xff] %v903_v17  ;;  %v1105_v20 = vpop.f32.mrb[23].mxu1 }
 0x602   :  { %1264 = shalt.err (!%p1261_p8)
}
 0x603   :  { %s1265_s5 = scalar_lea.hbm %s1512_s7, 512 }
 0x604   :  { %p1266_p9 = scmp.ne.s32.totalorder %s1512_s7, %s1265_s5  ;;  %p1269_p10 = scmp.lt.u32.totalorder %s1265_s5, %s1512_s7 }
 0x606   :  { %p1271_p11 = pnand %p1269_p10, %p1266_p9 }
 0x608   :  { %1274 = shalt.err (!%p1271_p11)
}
 0x609   :  { %s1292_s27 = smov 128   ;;  %s1293_s28 = smov 8  }
 0x60a   :  { %921 = dma.vmem_to_hbm [thread:$0]  %s916_s24, 512, %s1512_s7, [#allocation4], %s1292_s27, %s1292_s27, %s1293_s28  }
 0x60b   :  { %1281 = dma.done.wait [#allocation4], 512  }
 0x60c   :  { %1282 = vsyncadd [#allocation4], 4294966784 }
 0x60d   :  { %925 = vsyncpa [#allocation3], 1 }
 0x60e   :  { %926 = vsyncpa [#allocation6], 1 }
 0x60f   :  { %927 = vsyncpa [#allocation9], 1 }
 0x610   :  { %928 = vsyncpa [#allocation4], 1 }

</bundles_post_ra>
